<compile_context>
chip_gen: v7x
topology: tpu7x:2x2x1
jax: 0.10.0
libtpu: 0.0.40
codegen_flags: <defaults>
</compile_context>

<pallas_src>
import functools

import jax
import jax.numpy as jnp
from jax.experimental import pallas as pl
from jax.experimental.pallas import tpu as pltpu


def _round_up(a: int, m: int) -> int:
    return (a + m - 1) // m * m


def mlp_kernel(x_ref, w1_ref, b1_ref, w2_ref, b2_ref, o_ref):
    # hidden = relu(x @ W1 + b1): bf16 MXU matmul, f32 accumulate, f32 epilogue.
    h = jnp.dot(x_ref[...], w1_ref[...], preferred_element_type=jnp.float32)
    h = jnp.maximum(h + b1_ref[...], 0.0)            # (TM, H) + (1, H) broadcast
    # out = hidden @ W2 + b2: cast hidden to bf16 only as the MXU operand.
    out = jnp.dot(h.astype(w2_ref.dtype), w2_ref[...],
                  preferred_element_type=jnp.float32)
    o_ref[...] = (out + b2_ref[...]).astype(o_ref.dtype)   # (TM, O_pad) + (1, O_pad)


@functools.partial(jax.jit, static_argnames=("tile_m", "mxu_dtype"))
def bernoulli_prior_decoder_forward(x, w1, b1, w2, b2, *, tile_m=512,
                                    mxu_dtype=jnp.bfloat16):
    """x: (B, D_in), w1: (D_in, H), b1: (H,)|(1,H), w2: (H, O), b2: (O,)|(1,O)."""
    B, D_in = x.shape
    H = w1.shape[1]
    O = w2.shape[1]

    # Batch tile: at least 8 (sublane multiple), at most tile_m.
    TM = min(tile_m, _round_up(B, 8))
    B_pad = _round_up(B, TM)
    # Lane-dense output width (avoid masked vst on narrow O).
    O_pad = _round_up(O, 128)

    # --- wrapper-side padding / casting (done once, outside the grid loop) ---
    x_p = jnp.pad(x, ((0, B_pad - B), (0, 0))) if B_pad != B else x
    w2_p = jnp.pad(w2, ((0, 0), (0, O_pad - O))) if O_pad != O else w2
    b2_r = b2.reshape(1, O)
    b2_p = jnp.pad(b2_r, ((0, 0), (0, O_pad - O))) if O_pad != O else b2_r

    x_mxu = x_p.astype(mxu_dtype)
    w1_mxu = w1.astype(mxu_dtype)
    w2_mxu = w2_p.astype(mxu_dtype)
    b1_f32 = b1.reshape(1, H).astype(jnp.float32)
    b2_f32 = b2_p.astype(jnp.float32)

    grid = (B_pad // TM,)

    out_padded = pl.pallas_call(
        mlp_kernel,
        out_shape=jax.ShapeDtypeStruct((B_pad, O_pad), jnp.float32),
        grid_spec=pltpu.PrefetchScalarGridSpec(
            num_scalar_prefetch=0,
            grid=grid,
            in_specs=[
                # x tile marches over the batch.
                pl.BlockSpec((TM, D_in), lambda i: (i, 0)),
                # weights / biases: constant index_map -> resident in VMEM.
                pl.BlockSpec((D_in, H), lambda i: (0, 0)),
                pl.BlockSpec((1, H), lambda i: (0, 0)),
                pl.BlockSpec((H, O_pad), lambda i: (0, 0)),
                pl.BlockSpec((1, O_pad), lambda i: (0, 0)),
            ],
            out_specs=pl.BlockSpec((TM, O_pad), lambda i: (i, 0)),
        ),
        compiler_params=pltpu.CompilerParams(
            # Batch tiles are independent -> megacore-shardable on v7x.
            dimension_semantics=("parallel",),
            # Explicit, modest limit: safe under v7x's 64 MiB VMEM; our
            # footprint (resident weights + double-buffered tiles) is << this.
            vmem_limit_bytes=32 * 1024 * 1024,
        ),
    )(x_mxu, w1_mxu, b1_f32, w2_mxu, b2_f32)

    # Strip batch padding and the zero-padded output lanes.
    return out_padded[:B, :O].astype(x.dtype)


def init_params(key, input_dim, hidden_dim, output_dim, dtype=jnp.float32):
    """Deterministic init mimicking nn.Linear (uniform +/- 1/sqrt(fan_in)).

    Weights are stored transposed relative to PyTorch (in, out) so the kernel
    computes x @ W directly.
    """
    k1, k2, k3, k4 = jax.random.split(key, 4)
    bound1 = 1.0 / (input_dim ** 0.5)
    bound2 = 1.0 / (hidden_dim ** 0.5)
    w1 = jax.random.uniform(k1, (input_dim, hidden_dim), dtype, -bound1, bound1)
    b1 = jax.random.uniform(k2, (hidden_dim,), dtype, -bound1, bound1)
    w2 = jax.random.uniform(k3, (hidden_dim, output_dim), dtype, -bound2, bound2)
    b2 = jax.random.uniform(k4, (output_dim,), dtype, -bound2, bound2)
    return w1, b1, w2, b2


def ref_forward(x, w1, b1, w2, b2, mxu_dtype=jnp.bfloat16):
    """Plain-JAX reference with the same bf16 operand rounding, f32 accumulate."""
    xb = x.astype(mxu_dtype).astype(jnp.float32)
    w1b = w1.astype(mxu_dtype).astype(jnp.float32)
    w2b = w2.astype(mxu_dtype).astype(jnp.float32)
    h = jnp.maximum(xb @ w1b + b1.reshape(1, -1).astype(jnp.float32), 0.0)
    hb = h.astype(mxu_dtype).astype(jnp.float32)
    return hb @ w2b + b2.reshape(1, -1).astype(jnp.float32)


if __name__ == "__main__":
    # Shapes consistent with the module: input_dim=16, hidden_dim=32, output_dim=64.
    D_in, H, O = 16, 32, 64
    key = jax.random.PRNGKey(0)
    k_x, k_x2, k_p = jax.random.split(key, 3)
    w1, b1, w2, b2 = init_params(k_p, D_in, H, O)

    # Case 1: tiny batch (module's sample_distributions style input: Bernoulli(0.5)).
    B = 8
    x = jax.random.bernoulli(k_x, 0.5, (B, D_in)).astype(jnp.float32)
    out = jax.block_until_ready(bernoulli_prior_decoder_forward(x, w1, b1, w2, b2))
    ref = ref_forward(x, w1, b1, w2, b2)
    assert out.shape == (B, O)
    assert jnp.allclose(out, ref, atol=1e-3, rtol=1e-3)

    # Case 2: non-multiple batch to exercise batch tiling + padding (grid > 1).
    B2 = 1037
    x2 = jax.random.bernoulli(k_x2, 0.5, (B2, D_in)).astype(jnp.float32)
    out2 = jax.block_until_ready(bernoulli_prior_decoder_forward(x2, w1, b1, w2, b2))
    ref2 = ref_forward(x2, w1, b1, w2, b2)
    assert out2.shape == (B2, O)
    assert jnp.allclose(out2, ref2, atol=1e-3, rtol=1e-3)

    print("KERNEL_OK")
</pallas_src>

<mosaic_0001>
module attributes {stable_mosaic.version = 11 : i64} {
  func.func @mlp_kernel(%arg0: i32, %arg1: memref<8x16xbf16, #tpu.memory_space<vmem>>, %arg2: memref<16x32xbf16, #tpu.memory_space<vmem>>, %arg3: memref<1x32xf32, #tpu.memory_space<vmem>>, %arg4: memref<32x128xbf16, #tpu.memory_space<vmem>>, %arg5: memref<1x128xf32, #tpu.memory_space<vmem>>, %arg6: memref<8x128xf32, #tpu.memory_space<vmem>>) attributes {dimension_semantics = [#tpu.dimension_semantics<parallel>], iteration_bounds = array<i64: 1>, scalar_prefetch = 0 : i64, scratch_operands = 0 : i64, tpu.core_type = #tpu.core_type<tc>, window_params = [{transform_indices = @transform_0, window_bounds = array<i64: 8, 16>}, {pipeline_mode = #tpu.pipeline_mode<synchronous>, transform_indices = @transform_1, window_bounds = array<i64: 16, 32>}, {pipeline_mode = #tpu.pipeline_mode<synchronous>, transform_indices = @transform_2, window_bounds = array<i64: 1, 32>}, {pipeline_mode = #tpu.pipeline_mode<synchronous>, transform_indices = @transform_3, window_bounds = array<i64: 32, 128>}, {pipeline_mode = #tpu.pipeline_mode<synchronous>, transform_indices = @transform_4, window_bounds = array<i64: 1, 128>}, {transform_indices = @transform_5, window_bounds = array<i64: 8, 128>}]} {
    %c0 = arith.constant 0 : index
    %c0_0 = arith.constant 0 : index
    %0 = vector.load %arg1[%c0, %c0_0] : memref<8x16xbf16, #tpu.memory_space<vmem>>, vector<8x16xbf16>
    %c0_1 = arith.constant 0 : index
    %c0_2 = arith.constant 0 : index
    %1 = vector.load %arg2[%c0_1, %c0_2] : memref<16x32xbf16, #tpu.memory_space<vmem>>, vector<16x32xbf16>
    %cst = arith.constant dense<0.000000e+00> : vector<8x32xf32>
    %2 = tpu.matmul %0, %1, %cst {dimension_numbers = #tpu.dot_dimension_numbers<[1], [0], [0], [1], [0, 0, 1, 1], [], []>} : vector<8x16xbf16>, vector<16x32xbf16>, vector<8x32xf32> -> vector<8x32xf32>
    %c0_3 = arith.constant 0 : index
    %c0_4 = arith.constant 0 : index
    %3 = vector.load %arg3[%c0_3, %c0_4] : memref<1x32xf32, #tpu.memory_space<vmem>>, vector<1x32xf32>
    %4 = vector.broadcast %3 : vector<1x32xf32> to vector<8x32xf32>
    %5 = arith.addf %2, %4 : vector<8x32xf32>
    %cst_5 = arith.constant 0.000000e+00 : f32
    %6 = vector.broadcast %cst_5 : f32 to vector<8x32xf32>
    %7 = arith.maximumf %5, %6 : vector<8x32xf32>
    %8 = arith.truncf %7 : vector<8x32xf32> to vector<8x32xbf16>
    %c0_6 = arith.constant 0 : index
    %c0_7 = arith.constant 0 : index
    %9 = vector.load %arg4[%c0_6, %c0_7] : memref<32x128xbf16, #tpu.memory_space<vmem>>, vector<32x128xbf16>
    %cst_8 = arith.constant dense<0.000000e+00> : vector<8x128xf32>
    %10 = tpu.matmul %8, %9, %cst_8 {dimension_numbers = #tpu.dot_dimension_numbers<[1], [0], [0], [1], [0, 0, 1, 1], [], []>} : vector<8x32xbf16>, vector<32x128xbf16>, vector<8x128xf32> -> vector<8x128xf32>
    %c0_9 = arith.constant 0 : index
    %c0_10 = arith.constant 0 : index
    %11 = vector.load %arg5[%c0_9, %c0_10] : memref<1x128xf32, #tpu.memory_space<vmem>>, vector<1x128xf32>
    %12 = vector.broadcast %11 : vector<1x128xf32> to vector<8x128xf32>
    %13 = arith.addf %10, %12 : vector<8x128xf32>
    %c0_11 = arith.constant 0 : index
    %c0_12 = arith.constant 0 : index
    %14 = vector.load %arg6[%c0_11, %c0_12] : memref<8x128xf32, #tpu.memory_space<vmem>>, vector<8x128xf32>
    tpu.vector_store %arg6[%c0_11, %c0_12], %13 {strides = array<i32>} : memref<8x128xf32, #tpu.memory_space<vmem>>, vector<8x128xf32>,
    return
  }
  func.func @transform_0(%arg0: i32) -> (i32, i32) {
    %c0_i32 = arith.constant 0 : i32
    %c0_i32_0 = arith.constant 0 : i32
    return %arg0, %c0_i32 : i32, i32
  }
  func.func @transform_1(%arg0: i32) -> (i32, i32) {
    %c0_i32 = arith.constant 0 : i32
    %c0_i32_0 = arith.constant 0 : i32
    %c0_i32_1 = arith.constant 0 : i32
    return %c0_i32, %c0_i32_0 : i32, i32
  }
  func.func @transform_2(%arg0: i32) -> (i32, i32) {
    %c0_i32 = arith.constant 0 : i32
    %c0_i32_0 = arith.constant 0 : i32
    %c0_i32_1 = arith.constant 0 : i32
    return %c0_i32, %c0_i32_0 : i32, i32
  }
  func.func @transform_3(%arg0: i32) -> (i32, i32) {
    %c0_i32 = arith.constant 0 : i32
    %c0_i32_0 = arith.constant 0 : i32
    %c0_i32_1 = arith.constant 0 : i32
    return %c0_i32, %c0_i32_0 : i32, i32
  }
  func.func @transform_4(%arg0: i32) -> (i32, i32) {
    %c0_i32 = arith.constant 0 : i32
    %c0_i32_0 = arith.constant 0 : i32
    %c0_i32_1 = arith.constant 0 : i32
    return %c0_i32, %c0_i32_0 : i32, i32
  }
  func.func @transform_5(%arg0: i32) -> (i32, i32) {
    %c0_i32 = arith.constant 0 : i32
    %c0_i32_0 = arith.constant 0 : i32
    return %arg0, %c0_i32 : i32, i32
  }
}

</mosaic_0001>

<bundles_post_ra>
// kernel: bernoulli_prior_decoder_forward.1
= control target key start
LH: loop header
LB: loop body
LE: loop exit
PB: predicated region body
PF: predicated region fallthrough
CT: control target
= control target key end

     0   :  { %v222_v1 = vmov 0.0   ;;  %vm38_vm0 = vcmask 130048   ;;  %vm223_vm1 = vmmov 0   ;;  %s285_s0 = inlined_call_operand.vmem [shape: bf16[8,16], index: 0, kind: input, shape index: {}]   ;;  %s286_s1 = inlined_call_operand.vmem [shape: bf16[16,32], index: 1, kind: input, shape index: {}]   ;;  %s287_s2 = inlined_call_operand.vmem [shape: f32[1,32], index: 2, kind: input, shape index: {}]   ;;  %s288_s3 = inlined_call_operand.vmem [shape: bf16[32,128], index: 3, kind: input, shape index: {}]   ;;  %s289_s4 = inlined_call_operand.vmem [shape: f32[1,128], index: 4, kind: input, shape index: {}]   ;;  %s290_s5 = inlined_call_operand.hbm [shape: f32[8,128], index: 5, kind: output, shape index: {}]  }
   0x1   :  { %v195_v0 = vld [vmem:[%s286_s1] sm:$0xff]   ;;  %178 = vmatprep.subr.bf16.mxu0 %v222_v1  ;;  %184 = vmatprep.subr.bf16.mxu1 %v222_v1 }
   0x2   :  { %v22_v2 = vld [vmem:[%s285_s0] sm:$0xf]  ;;  %179 = vmatpush3.bf16.msra.mxu0 %v195_v0  ;;  %180 = vmatprep.mubr.msk.bf16.mxu0 %vm223_vm1, %v222_v1 }
   0x3   :  { %188 = vmatprep.mubr.msk.bf16.mxu1 %vm223_vm1, %v222_v1 }
   0x4   :  { %10 = vsyncpa [#allocation3], 0  ;;  %v196_v3 = vld [vmem:[%s288_s3] sm:$0xff]   ;;  %v197_v4 = vld [vmem:[%s288_s3 + $0x8] sm:$0xff]   ;;  %vm107_vm2 = vcmask 261120   ;;  %s224_s28 = smov [#allocation2]  }
   0x5   :  { %181 = vmatmul.mubr.msk.bf16.vlgmr.msra.gmra.mrb[0].mxu0 %vm38_vm0, %v22_v2  ;;  %185 = vmatpush3.bf16.msra.mxu1 %v196_v3  ;;  %v166_v5 = vld [vmem:[%s287_s2] ss:$0 sm:$0xff]  ;;  %s158_s3 = sshll.u32 %s224_s28, 4  ;;  %s159_s3 = int_to_ptr.vmem [resolvable:$true] %s158_s3 }
   0x6   :  { %186 = vmatprep.subr.bf16.mxu1 %v222_v1  ;;  %v169_v13 = vld [vmem:[%s289_s4] ss:$0 sm:$0xff]  ;;  %s198_s2 = scalar_lea.vmem %s159_s3, 128  ;;  %p203_p1 = scmp.lt.s32.totalorder %s159_s3, %s159_s3 }
   0x7   :  { %p199_p0 = scmp.ne.s32.totalorder %s159_s3, %s198_s2  ;;  %p204_p2 = scmp.lt.s32.totalorder %s198_s2, %s198_s2 }
   0x9   :  { %187 = vmatpush3.bf16.msra.mxu1 %v197_v4  ;;  %p205_p3 = por %p204_p2, %p203_p1 }
   0xb   :  { %p206_p4 = pnand %p205_p3, %p199_p0 }
  0xd8   :  { %v76_v6 = vpop.f32.mrb[0].mxu0 }
  0xd9   :  { %v77_v7 = vadd.f32 %v166_v5, %v76_v6  ;;  %v182_v8 = vpop.f32.mrb[1].mxu0 }
  0xda   :  { %v79_v9 = vpop.f32.mrb[2].mxu0 }
  0xdb   :  { %v82_v10 = vmax.f32 %v77_v7, 0.0  ;;  %v183_v11 = vpop.f32.mrb[3].mxu0 }
  0xdd   :  { %v83_v12 = vpack.c.bf16 %v82_v10, %v82_v10 }
  0xdf   :  { %189 = vmatmul.mubr.msk.bf16.vlgmr.msra.gmra.mrb[0].mxu1 %vm107_vm2, %v83_v12 }
 0x1b2   :  { %v145_v14 = vpop.f32.mrb[0].mxu1 }
 0x1b3   :  { %v146_v15 = vadd.f32 %v169_v13, %v145_v14  ;;  %v190_v16 = vpop.f32.mrb[1].mxu1 }
 0x1b4   :  { %v148_v17 = vpop.f32.mrb[2].mxu1 }
 0x1b5   :  { %151 = vst [vmem:[#allocation2] sm:$0xff] %v146_v15  ;;  %v191_v18 = vpop.f32.mrb[3].mxu1 }
 0x1b6   :  { %209 = shalt.err (!%p206_p4)
}
 0x1b7   :  { %s210_s4 = scalar_lea.hbm %s290_s5, 128 }
 0x1b8   :  { %p211_p5 = scmp.ne.s32.totalorder %s290_s5, %s210_s4  ;;  %p214_p6 = scmp.lt.u32.totalorder %s210_s4, %s290_s5 }
 0x1ba   :  { %p216_p7 = pnand %p214_p6, %p211_p5 }
 0x1bc   :  { %219 = shalt.err (!%p216_p7)
}
 0x1bd   :  { %161 = dma.vmem_to_hbm [thread:$0]  %s159_s3, 128, %s290_s5, [#allocation3]  }
 0x1be   :  { %220 = dma.done.wait [#allocation3], 128  }
 0x1bf   :  { %221 = vsyncadd [#allocation3], 4294967168 }
 0x1c0   :  { %165 = vsyncpa [#allocation3], 1 }

</bundles_post_ra>
